<compile_context>
chip_gen: v6e
topology: v6e:2x2x1
jax: 0.10.0
libtpu: 0.0.40
codegen_flags: <defaults>
</compile_context>

<pallas_src>
import jax
import jax.numpy as jnp
from jax.experimental import pallas as pl
from jax.experimental.pallas import tpu as pltpu


# -----------------------------------------------------------------------------
# Fused kernel: (Spatial ∘ 'same'-pad ∘ VARConv) + ReLU + MaxPool + flatten + head
# -----------------------------------------------------------------------------
def _varcnn_fused_kernel(x_ref, wtoep_ref, bpos_ref, whead_ref, bhead_ref, o_ref):
    # x_ref     : (B, P*C)      bf16, flattened (time, channel) input
    # wtoep_ref : (P*C, P*S)    bf16, block-Toeplitz (pad+shift+Spatial+VARConv) weight,
    #                           output columns permuted to [even-time | odd-time]
    # bpos_ref  : (1, P*S)      f32,  position-dependent bias (edge-exact), same perm
    # whead_ref : (Ph*S, 128)   bf16, head weight in pooled (t, s) order, zero-padded cols
    # bhead_ref : (1, 128)      f32
    # o_ref     : (B, 128)      f32, padded logits (first num_classes columns are real)
    half = whead_ref.shape[0]                        # Ph * S

    # Spatial Linear + 'same' zero padding + all VARConv taps: ONE MXU matmul.
    z = jnp.dot(x_ref[...], wtoep_ref[...], preferred_element_type=jnp.float32)
    z = jnp.maximum(z + bpos_ref[...], 0.0)          # bias + nn.ReLU, (B, P*S) f32

    # nn.MaxPool2d((1,2),(1,2)) over time: columns were permuted on the host into
    # [even-time | odd-time] halves, so the pool is one maximum of two 128-aligned
    # lane slices (no reshape / relayout).
    pooled = jnp.maximum(z[:, :half], z[:, half:])   # (B, Ph*S)

    # TensorView flatten + Dropout(eval=identity) + Linear head: one MXU matmul,
    # then a single unmasked lane-dense (B, 128) store.
    out = jnp.dot(pooled.astype(whead_ref.dtype), whead_ref[...],
                  preferred_element_type=jnp.float32) + bhead_ref[...]
    o_ref[...] = out.astype(o_ref.dtype)


def varcnn_forward(x_ncp1, kp, num_classes):
    """VARCNN.forward: x (B, C, P, 1) -> logits (B, num_classes), one pallas_call."""
    B, C, P, _ = x_ncp1.shape
    PC, PS = kp["w_toep"].shape
    HS, NPAD = kp["w_head"].shape
    # Transpose(1,2) + squeeze + flatten to (B, P*C): one cheap XLA relayout; all
    # compute happens in the single fused Pallas kernel below.
    x_flat = (jnp.transpose(x_ncp1, (0, 2, 1, 3))
              .reshape(B, P * C).astype(kp["w_toep"].dtype))
    vmem = pl.BlockSpec(memory_space=pltpu.MemorySpace.VMEM)
    cost = pl.CostEstimate(
        flops=2 * B * PC * PS + 2 * B * HS * NPAD,
        transcendentals=0,
        bytes_accessed=(B * PC * 2 + PC * PS * 2 + PS * 4
                        + HS * NPAD * 2 + NPAD * 4 + B * NPAD * 4),
    )
    logits_pad = pl.pallas_call(
        _varcnn_fused_kernel,
        out_shape=jax.ShapeDtypeStruct((B, NPAD), jnp.float32),
        in_specs=[vmem] * 5,
        out_specs=vmem,
        cost_estimate=cost,
        # No grid: the whole problem is a few hundred KiB and fits one VMEM block;
        # per-grid-step overhead (~0.35 us) would dominate at this size.
        # TODO(synk): for larger B, add grid=(B//tb,) over the batch with
        #             dimension_semantics=("parallel",) to use v7x's second TensorCore,
        #             and re-derive tiling against 64 MiB VMEM (Toeplitz weight is O(P^2)).
    )(x_flat, kp["w_toep"], kp["b_pos"], kp["w_head"], kp["b_head"])
    return logits_pad[:, :num_classes]


# -----------------------------------------------------------------------------
# Parameters (layout: y = x @ W + b, i.e. torch weights transposed) and host-side
# weight composition (done once, outside the jitted forward -> free at runtime).
# -----------------------------------------------------------------------------
def make_params(key, C, P, S, num_classes, K=7):
    ks = jax.random.split(key, 6)
    Ph = P // 2
    return {
        "spatial_w": 0.1 * jax.random.normal(ks[0], (C, S), jnp.float32),
        "spatial_b": 0.05 * jax.random.normal(ks[1], (S,), jnp.float32),
        # tap k stored as (S_in, S_out); torch Conv1d weight (S_out, S_in, K) == w[k].T
        "var_w": 0.1 * jax.random.normal(ks[2], (K, S, S), jnp.float32),
        "var_b": 0.05 * jax.random.normal(ks[3], (S,), jnp.float32),
        # final Linear over torch flatten order: feature index = s * Ph + t
        "lin_w": 0.05 * jax.random.normal(ks[4], (S * Ph, num_classes), jnp.float32),
        "lin_b": 0.05 * jax.random.normal(ks[5], (num_classes,), jnp.float32),
    }


def fuse_params(p, P, n_pad=128):
    K, S, _ = p["var_w"].shape
    C = p["spatial_w"].shape[0]
    PAD = K // 2
    Ph = P // 2
    N = p["lin_w"].shape[1]
    f32 = jnp.float32

    # Spatial Linear composed into each VARConv tap: w_conv[k] = spatial_w @ var_w[k]
    w_conv = jnp.einsum("cs,kso->kco", p["spatial_w"], p["var_w"])          # (K, C, S)

    # Block-Toeplitz weight: z[t,o] = sum_{t_in,c} x[t_in,c] * W[t_in*C+c, col(t,o)].
    # 'same' zero padding is encoded by simply omitting out-of-range taps (zero rows).
    t_in = jnp.arange(P)[:, None]
    t_out = jnp.arange(P)[None, :]
    k = t_in - t_out + PAD                                                  # (P_in, P_out)
    valid = ((k >= 0) & (k < K)).astype(f32)
    blocks = w_conv[jnp.clip(k, 0, K - 1)] * valid[:, :, None, None]        # (P,P,C,S)
    w_toep = blocks.transpose(0, 2, 1, 3).reshape(P * C, P, S)              # rows = t_in*C+c
    # Permute output times to [even | odd] so the in-kernel MaxPool is a lane slice.
    perm = jnp.concatenate([jnp.arange(0, P, 2), jnp.arange(1, P, 2)])
    w_toep = w_toep[:, perm, :].reshape(P * C, P * S)

    # Position-dependent bias: spatial bias pushed through only the in-range taps
    # (exact at the zero-padded edges) + conv bias; same output-time permutation.
    tap_bias = jnp.einsum("s,kso->ko", p["spatial_b"], p["var_w"])          # (K, S)
    t_idx = jnp.arange(P)[:, None]
    k_idx = jnp.arange(K)[None, :]
    valid_b = ((t_idx + k_idx - PAD >= 0) & (t_idx + k_idx - PAD < P)).astype(f32)
    b_pos = p["var_b"][None, :] + valid_b @ tap_bias                        # (P, S)
    b_pos = b_pos[perm].reshape(1, P * S)

    # Head weight: torch flatten is source-major (feature = s*Ph + t); the pooled
    # kernel layout is (t, s) -> t*S + s.  Zero-pad classes to n_pad for a lane-dense
    # final store (logits sliced back to N outside the kernel).
    w_head = p["lin_w"].reshape(S, Ph, N).transpose(1, 0, 2).reshape(Ph * S, N)
    w_head = jnp.zeros((Ph * S, n_pad), f32).at[:, :N].set(w_head)
    b_head = jnp.zeros((1, n_pad), f32).at[:, :N].set(p["lin_b"])

    return {
        "w_toep": w_toep.astype(jnp.bfloat16),   # bf16 MXU operands, f32 accumulation
        "b_pos": b_pos.astype(f32),
        "w_head": w_head.astype(jnp.bfloat16),
        "b_head": b_head.astype(f32),
    }


# -----------------------------------------------------------------------------
# Pure-JAX reference (mirrors the PyTorch forward) for a correctness sanity check.
# -----------------------------------------------------------------------------
def varcnn_reference(x_ncp1, p):
    B, C, P, _ = x_ncp1.shape
    hp = jax.lax.Precision.HIGHEST
    x = jnp.transpose(x_ncp1, (0, 2, 1, 3))[..., 0]                          # (B, P, C)
    y = jnp.einsum("bpc,cs->bps", x, p["spatial_w"], precision=hp) + p["spatial_b"]
    K = p["var_w"].shape[0]
    pad = K // 2
    y_pad = jnp.pad(y, ((0, 0), (pad, pad), (0, 0)))
    z = sum(jnp.einsum("bps,so->bpo", y_pad[:, k:k + P, :], p["var_w"][k], precision=hp)
            for k in range(K)) + p["var_b"]
    z = jnp.maximum(z, 0.0)                                                  # ReLU
    z_t = jnp.transpose(z, (0, 2, 1))                                        # (B, S, P)
    pooled = jnp.maximum(z_t[:, :, 0::2], z_t[:, :, 1::2])                   # MaxPool2d((1,2))
    flat = pooled.reshape(B, -1)                                             # TensorView
    # Dropout(p=0.5) in eval mode == identity
    return jnp.einsum("bf,fn->bn", flat, p["lin_w"], precision=hp) + p["lin_b"]


# -----------------------------------------------------------------------------
if __name__ == "__main__":
    # cfg: DATASET.CHANNELS=8, DATASET.POINTS=32, DATASET.NUM_CLASSES=4,
    #      MODEL.ARGS.MAX_POOL=2, MODEL.ARGS.SOURCE_CHANNELS=16
    B, C, P, S, NUM_CLASSES = 2, 8, 32, 16, 4

    key = jax.random.PRNGKey(0)
    k_params, k_x = jax.random.split(key)
    params = make_params(k_params, C, P, S, NUM_CLASSES)
    kernel_params = fuse_params(params, P)              # one-time host-side composition

    x = jax.random.normal(k_x, (B, C, P, 1), jnp.float32)

    fwd = jax.jit(varcnn_forward, static_argnums=2)
    logits = fwd(x, kernel_params, NUM_CLASSES)
    jax.block_until_ready(logits)

    assert logits.shape == (B, NUM_CLASSES)

    ref = varcnn_reference(x, params)
    max_err = float(jnp.max(jnp.abs(logits - ref)))
    # bf16 MXU operands with f32 accumulation -> loose but meaningful tolerance.
    assert jnp.allclose(logits, ref, atol=2e-2, rtol=2e-2), f"max abs err {max_err}"

    print("KERNEL_OK")
</pallas_src>

<mosaic_0001>
module attributes {stable_mosaic.version = 11 : i64} {
  func.func @_varcnn_fused_kernel(%arg0: memref<2x256xbf16, #tpu.memory_space<vmem>>, %arg1: memref<256x512xbf16, #tpu.memory_space<vmem>>, %arg2: memref<1x512xf32, #tpu.memory_space<vmem>>, %arg3: memref<256x128xbf16, #tpu.memory_space<vmem>>, %arg4: memref<1x128xf32, #tpu.memory_space<vmem>>, %arg5: memref<2x128xf32, #tpu.memory_space<vmem>>) attributes {dimension_semantics = [], scalar_prefetch = 0 : i64, scratch_operands = 0 : i64, tpu.core_type = #tpu.core_type<tc>} {
    %c0 = arith.constant 0 : index
    %c0_0 = arith.constant 0 : index
    %0 = vector.load %arg0[%c0, %c0_0] : memref<2x256xbf16, #tpu.memory_space<vmem>>, vector<2x256xbf16>
    %c0_1 = arith.constant 0 : index
    %c0_2 = arith.constant 0 : index
    %1 = vector.load %arg1[%c0_1, %c0_2] : memref<256x512xbf16, #tpu.memory_space<vmem>>, vector<256x512xbf16>
    %cst = arith.constant dense<0.000000e+00> : vector<2x512xf32>
    %2 = tpu.matmul %0, %1, %cst {dimension_numbers = #tpu.dot_dimension_numbers<[1], [0], [0], [1], [0, 0, 1, 1], [], []>} : vector<2x256xbf16>, vector<256x512xbf16>, vector<2x512xf32> -> vector<2x512xf32>
    %c0_3 = arith.constant 0 : index
    %c0_4 = arith.constant 0 : index
    %3 = vector.load %arg2[%c0_3, %c0_4] : memref<1x512xf32, #tpu.memory_space<vmem>>, vector<1x512xf32>
    %4 = vector.broadcast %3 : vector<1x512xf32> to vector<2x512xf32>
    %5 = arith.addf %2, %4 : vector<2x512xf32>
    %cst_5 = arith.constant 0.000000e+00 : f32
    %6 = vector.broadcast %cst_5 : f32 to vector<2x512xf32>
    %7 = arith.maximumf %5, %6 : vector<2x512xf32>
    %8 = vector.extract_strided_slice %7 {offsets = [0, 0], sizes = [2, 256], strides = [1, 1]} : vector<2x512xf32> to vector<2x256xf32>
    %9 = vector.extract_strided_slice %7 {offsets = [0, 256], sizes = [2, 256], strides = [1, 1]} : vector<2x512xf32> to vector<2x256xf32>
    %10 = arith.maximumf %8, %9 : vector<2x256xf32>
    %11 = arith.truncf %10 : vector<2x256xf32> to vector<2x256xbf16>
    %c0_6 = arith.constant 0 : index
    %c0_7 = arith.constant 0 : index
    %12 = vector.load %arg3[%c0_6, %c0_7] : memref<256x128xbf16, #tpu.memory_space<vmem>>, vector<256x128xbf16>
    %cst_8 = arith.constant dense<0.000000e+00> : vector<2x128xf32>
    %13 = tpu.matmul %11, %12, %cst_8 {dimension_numbers = #tpu.dot_dimension_numbers<[1], [0], [0], [1], [0, 0, 1, 1], [], []>} : vector<2x256xbf16>, vector<256x128xbf16>, vector<2x128xf32> -> vector<2x128xf32>
    %c0_9 = arith.constant 0 : index
    %c0_10 = arith.constant 0 : index
    %14 = vector.load %arg4[%c0_9, %c0_10] : memref<1x128xf32, #tpu.memory_space<vmem>>, vector<1x128xf32>
    %15 = vector.broadcast %14 : vector<1x128xf32> to vector<2x128xf32>
    %16 = arith.addf %13, %15 : vector<2x128xf32>
    %c0_11 = arith.constant 0 : index
    %c0_12 = arith.constant 0 : index
    %17 = vector.load %arg5[%c0_11, %c0_12] : memref<2x128xf32, #tpu.memory_space<vmem>>, vector<2x128xf32>
    tpu.vector_store %arg5[%c0_11, %c0_12], %16 {strides = array<i32>} : memref<2x128xf32, #tpu.memory_space<vmem>>, vector<2x128xf32>,
    return
  }
}

</mosaic_0001>

<bundles_post_ra>
// kernel: varcnn_forward.1
= control target key start
LH: loop header
LB: loop body
LE: loop exit
PB: predicated region body
PF: predicated region fallthrough
CT: control target
= control target key end

     0   :  { %10 = vsyncpa [#allocation3], 0  ;;  %s1117_s0 = inlined_call_operand.vmem [shape: bf16[2,256], index: 0, kind: input, shape index: {}]   ;;  %s1118_s1 = inlined_call_operand.hbm [shape: bf16[256,512], index: 1, kind: input, shape index: {}]   ;;  %s1119_s2 = inlined_call_operand.vmem [shape: f32[1,512], index: 2, kind: input, shape index: {}]   ;;  %s1120_s3 = inlined_call_operand.hbm [shape: bf16[256,128], index: 3, kind: input, shape index: {}]   ;;  %s1121_s4 = inlined_call_operand.vmem [shape: f32[1,128], index: 4, kind: input, shape index: {}]   ;;  %s1122_s5 = inlined_call_operand.hbm [shape: f32[2,128], index: 5, kind: output, shape index: {}]  }
   0x1   :  { %11 = vsyncpa [#allocation6], 0 }
   0x2   :  { %12 = vsyncpa [#allocation4], 0  ;;  %s1054_s18 = smov [#allocation2]  }
   0x3   :  { %s20_s19 = sshll.u32 %s1054_s18, 4  ;;  %s21_s19 = int_to_ptr.vmem [resolvable:$true] %s20_s19 }
   0x4   :  { %s996_s20 = scalar_lea.vmem %s21_s19, 8192  ;;  %p1001_p1 = scmp.lt.s32.totalorder %s21_s19, %s21_s19 }
   0x5   :  { %p997_p0 = scmp.ne.s32.totalorder %s21_s19, %s996_s20  ;;  %p1002_p2 = scmp.lt.s32.totalorder %s996_s20, %s996_s20 }
   0x7   :  { %p1003_p3 = por %p1002_p2, %p1001_p1 }
   0x9   :  { %p1004_p4 = pnand %p1003_p3, %p997_p0 }
   0xb   :  { %1007 = shalt.err (!%p1004_p4)
}
   0xc   :  { %s1055_s21 = smov 256   ;;  %s1056_s22 = smov 16  }
   0xd   :  { %26 = dma.hbm_to_vmem [thread:$0]  %s1118_s1, 8192, %s21_s19, [#allocation3], %s1055_s21, %s1055_s21, %s1056_s22  }
   0xe   :  { %s1057_s25 = smov [#allocation5]  }
   0xf   :  { %s34_s26 = sshll.u32 %s1057_s25, 4  ;;  %s35_s26 = int_to_ptr.vmem [resolvable:$true] %s34_s26 }
  0x10   :  { %s1016_s27 = scalar_lea.vmem %s35_s26, 2048  ;;  %p1021_p6 = scmp.lt.s32.totalorder %s35_s26, %s35_s26 }
  0x11   :  { %p1017_p5 = scmp.ne.s32.totalorder %s35_s26, %s1016_s27  ;;  %p1022_p7 = scmp.lt.s32.totalorder %s1016_s27, %s1016_s27 }
  0x13   :  { %p1023_p8 = por %p1022_p7, %p1021_p6 }
  0x15   :  { %p1024_p9 = pnand %p1023_p8, %p1017_p5 }
  0x17   :  { %1027 = shalt.err (!%p1024_p9)
}
  0x18   :  { %s1058_s28 = smov 64   ;;  %s1059_s29 = smov 4  }
  0x19   :  { %40 = dma.hbm_to_vmem [thread:$0]  %s1120_s3, 2048, %s35_s26, [#allocation6], %s1058_s28, %s1058_s28, %s1059_s29  }
  0x1a   :  { %1048 = dma.done.wait [#allocation3], 8192  }
  0x1b   :  { %1049 = vsyncadd [#allocation3], 4294959104 }
  0x1c   :  { %1050 = dma.done.wait [#allocation6], 2048  }
  0x1d   :  { %1051 = vsyncadd [#allocation6], 4294965248  ;;  %v876_v0 = vld [vmem:[#allocation2 + $0xe4] ss:$16 sps:$4 sm:$0xff]   ;;  %v878_v1 = vld [vmem:[#allocation2 + $0xec] ss:$16 sps:$4 sm:$0xff]   ;;  %v117_v38 = vlaneseq }
  0x1e   :  { %482 = vmatprep.subr.bf16.mxu0 %v876_v0  ;;  %v880_v2 = vld [vmem:[#allocation2 + $0xe0] ss:$16 sps:$4 sm:$0xff]   ;;  %v881_v3 = vld [vmem:[#allocation2 + $0xe8] ss:$16 sps:$4 sm:$0xff]   ;;  %523 = vmatprep.subr.bf16.mxu1 %v878_v1  ;;  %v882_v4 = vld [vmem:[#allocation2 + $0xc4] ss:$16 sps:$4 sm:$0xff]  }
  0x1f   :  { %483 = vmatpush1.bf16.msra.mxu0 %v880_v2  ;;  %524 = vmatpush1.bf16.msra.mxu1 %v881_v3  ;;  %v884_v5 = vld [vmem:[#allocation2 + $0xcc] ss:$16 sps:$4 sm:$0xff]   ;;  %v886_v6 = vld [vmem:[#allocation2 + $0xc0] ss:$16 sps:$4 sm:$0xff]   ;;  %v887_v7 = vld [vmem:[#allocation2 + $0xc8] ss:$16 sps:$4 sm:$0xff]  }
  0x20   :  { %484 = vmatprep.subr.bf16.mxu0 %v882_v4  ;;  %525 = vmatprep.subr.bf16.mxu1 %v884_v5  ;;  %v888_v8 = vld [vmem:[#allocation2 + $0xa4] ss:$16 sps:$4 sm:$0xff]   ;;  %v890_v9 = vld [vmem:[#allocation2 + $0xac] ss:$16 sps:$4 sm:$0xff]   ;;  %v892_v10 = vld [vmem:[#allocation2 + $0xa0] ss:$16 sps:$4 sm:$0xff]  }
  0x21   :  { %v893_v11 = vld [vmem:[#allocation2 + $0xa8] ss:$16 sps:$4 sm:$0xff]   ;;  %v894_v12 = vld [vmem:[#allocation2 + $0x84] ss:$16 sps:$4 sm:$0xff]   ;;  %v896_v13 = vld [vmem:[#allocation2 + $0x8c] ss:$16 sps:$4 sm:$0xff]  }
  0x22   :  { %v898_v14 = vld [vmem:[#allocation2 + $0x80] ss:$16 sps:$4 sm:$0xff]   ;;  %v899_v15 = vld [vmem:[#allocation2 + $0x88] ss:$16 sps:$4 sm:$0xff]   ;;  %v900_v16 = vld [vmem:[#allocation2 + $0x64] ss:$16 sps:$4 sm:$0xff]  }
  0x23   :  { %485 = vmatpush1.bf16.msra.mxu0 %v886_v6  ;;  %526 = vmatpush1.bf16.msra.mxu1 %v887_v7  ;;  %v902_v17 = vld [vmem:[#allocation2 + $0x6c] ss:$16 sps:$4 sm:$0xff]   ;;  %v904_v18 = vld [vmem:[#allocation2 + $0x60] ss:$16 sps:$4 sm:$0xff]   ;;  %v905_v19 = vld [vmem:[#allocation2 + $0x68] ss:$16 sps:$4 sm:$0xff]  }
  0x24   :  { %486 = vmatprep.subr.bf16.mxu0 %v888_v8  ;;  %527 = vmatprep.subr.bf16.mxu1 %v890_v9  ;;  %v906_v20 = vld [vmem:[#allocation2 + $0x44] ss:$16 sps:$4 sm:$0xff]   ;;  %v908_v21 = vld [vmem:[#allocation2 + $0x4c] ss:$16 sps:$4 sm:$0xff]   ;;  %v910_v22 = vld [vmem:[#allocation2 + $0x40] ss:$16 sps:$4 sm:$0xff]  }
  0x25   :  { %v911_v23 = vld [vmem:[#allocation2 + $0x48] ss:$16 sps:$4 sm:$0xff]   ;;  %v912_v24 = vld [vmem:[#allocation2 + $0x24] ss:$16 sps:$4 sm:$0xff]   ;;  %v914_v25 = vld [vmem:[#allocation2 + $0x2c] ss:$16 sps:$4 sm:$0xff]  }
  0x26   :  { %v916_v26 = vld [vmem:[#allocation2 + $0x20] ss:$16 sps:$4 sm:$0xff]   ;;  %v917_v27 = vld [vmem:[#allocation2 + $0x28] ss:$16 sps:$4 sm:$0xff]   ;;  %v918_v28 = vld [vmem:[#allocation2 + $0x4] ss:$16 sps:$4 sm:$0xff]  }
  0x27   :  { %487 = vmatpush1.bf16.msra.mxu0 %v892_v10  ;;  %528 = vmatpush1.bf16.msra.mxu1 %v893_v11  ;;  %v920_v29 = vld [vmem:[#allocation2 + $0xc] ss:$16 sps:$4 sm:$0xff]   ;;  %v922_v30 = vld [vmem:[#allocation2] ss:$16 sps:$4 sm:$0xff]   ;;  %v923_v31 = vld [vmem:[#allocation2 + $0x8] ss:$16 sps:$4 sm:$0xff]  }
  0x28   :  { %488 = vmatprep.subr.bf16.mxu0 %v894_v12  ;;  %529 = vmatprep.subr.bf16.mxu1 %v896_v13  ;;  %v924_v32 = vld [vmem:[#allocation2 + $0x1e4] ss:$16 sps:$4 sm:$0xff]   ;;  %v926_v33 = vld [vmem:[#allocation2 + $0x1ec] ss:$16 sps:$4 sm:$0xff]   ;;  %v928_v34 = vld [vmem:[#allocation2 + $0x1e0] ss:$16 sps:$4 sm:$0xff]  }
  0x29   :  { %v929_v35 = vld [vmem:[#allocation2 + $0x1e8] ss:$16 sps:$4 sm:$0xff]   ;;  %v930_v36 = vld [vmem:[#allocation2 + $0x1c4] ss:$16 sps:$4 sm:$0xff]   ;;  %v932_v37 = vld [vmem:[#allocation2 + $0x1cc] ss:$16 sps:$4 sm:$0xff]  }
  0x2a   :  { %v1060_v39 = vmov 1966171168   ;;  %v934_v41 = vld [vmem:[#allocation2 + $0x1c0] ss:$16 sps:$4 sm:$0xff]   ;;  %v935_v42 = vld [vmem:[#allocation2 + $0x1c8] ss:$16 sps:$4 sm:$0xff]  }
  0x2b   :  { %489 = vmatpush1.bf16.msra.mxu0 %v898_v14  ;;  %530 = vmatpush1.bf16.msra.mxu1 %v899_v15  ;;  %v147_v40 = vunpack.c.l.s4 %v1060_v39  ;;  %v936_v43 = vld [vmem:[#allocation2 + $0x1a4] ss:$16 sps:$4 sm:$0xff]   ;;  %v938_v44 = vld [vmem:[#allocation2 + $0x1ac] ss:$16 sps:$4 sm:$0xff]   ;;  %v1098_v45 = vshrl.u32 %v117_v38, 7  ;;  %s1061_s9 = smov [#allocation7]  }
  0x2c   :  { %490 = vmatprep.subr.bf16.mxu0 %v900_v16  ;;  %531 = vmatprep.subr.bf16.mxu1 %v902_v17  ;;  %v940_v47 = vld [vmem:[#allocation2 + $0x1a0] ss:$16 sps:$4 sm:$0xff]   ;;  %v941_v48 = vld [vmem:[#allocation2 + $0x1a8] ss:$16 sps:$4 sm:$0xff]   ;;  %v942_v49 = vld [vmem:[#allocation2 + $0x184] ss:$16 sps:$4 sm:$0xff]  }
  0x2d   :  { %v148_v46 = vunpack.c.0.s8 %v147_v40  ;;  %v944_v50 = vld [vmem:[#allocation2 + $0x18c] ss:$16 sps:$4 sm:$0xff]   ;;  %v946_v51 = vld [vmem:[#allocation2 + $0x180] ss:$16 sps:$4 sm:$0xff]   ;;  %v947_v52 = vld [vmem:[#allocation2 + $0x188] ss:$16 sps:$4 sm:$0xff]  }
  0x2e   :  { %v764_v54 = vld.sshfl [vmem:[%s1117_s0] sm:$0x11 pattern:$0x75316420]  ;;  %v948_v55 = vld [vmem:[#allocation2 + $0x164] ss:$16 sps:$4 sm:$0xff]  }
  0x2f   :  { %491 = vmatpush1.bf16.msra.mxu0 %v904_v18  ;;  %532 = vmatpush1.bf16.msra.mxu1 %v905_v19  ;;  %v151_v53 = vsub.s32 %v148_v46, %v1098_v45  ;;  %v145_v56 = vcombine.high %v764_v54, %v764_v54  ;;  %v950_v57 = vld [vmem:[#allocation2 + $0x16c] ss:$16 sps:$4 sm:$0xff]   ;;  %v952_v58 = vld [vmem:[#allocation2 + $0x160] ss:$16 sps:$4 sm:$0xff]   ;;  %v953_v60 = vld [vmem:[#allocation2 + $0x168] ss:$16 sps:$4 sm:$0xff]  }
  0x30   :  { %492 = vmatprep.subr.bf16.mxu0 %v906_v20  ;;  %533 = vmatprep.subr.bf16.mxu1 %v908_v21  ;;  %v954_v61 = vld [vmem:[#allocation2 + $0x144] ss:$16 sps:$4 sm:$0xff]   ;;  %v956_v62 = vld [vmem:[#allocation2 + $0x14c] ss:$16 sps:$4 sm:$0xff]   ;;  %v958_v63 = vld [vmem:[#allocation2 + $0x140] ss:$16 sps:$4 sm:$0xff]  }
  0x31   :  { %v159_v59 = vrot.slane %v145_v56, %v151_v53  ;;  %v959_v0 = vld [vmem:[#allocation2 + $0x148] ss:$16 sps:$4 sm:$0xff]   ;;  %v960_v1 = vld [vmem:[#allocation2 + $0x124] ss:$16 sps:$4 sm:$0xff]   ;;  %v962_v2 = vld [vmem:[#allocation2 + $0x12c] ss:$16 sps:$4 sm:$0xff]   ;;  %v152_v10 = vrot.slane %v764_v54, %v151_v53 }
  0x32   :  { %v964_v3 = vld [vmem:[#allocation2 + $0x120] ss:$16 sps:$4 sm:$0xff]   ;;  %v965_v4 = vld [vmem:[#allocation2 + $0x128] ss:$16 sps:$4 sm:$0xff]   ;;  %v966_v5 = vld [vmem:[#allocation2 + $0x104] ss:$16 sps:$4 sm:$0xff]  }
  0x33   :  { %493 = vmatpush1.bf16.msra.mxu0 %v910_v22  ;;  %534 = vmatpush1.bf16.msra.mxu1 %v911_v23  ;;  %v968_v6 = vld [vmem:[#allocation2 + $0x10c] ss:$16 sps:$4 sm:$0xff]   ;;  %v970_v7 = vld [vmem:[#allocation2 + $0x100] ss:$16 sps:$4 sm:$0xff]   ;;  %v971_v8 = vld [vmem:[#allocation2 + $0x108] ss:$16 sps:$4 sm:$0xff]  }
  0x34   :  { %494 = vmatprep.subr.bf16.mxu0 %v912_v24  ;;  %535 = vmatprep.subr.bf16.mxu1 %v914_v25  ;;  %v972_v9 = vld [vmem:[#allocation5 + $0x78] sm:$0xff]   ;;  %v974_v12 = vld [vmem:[#allocation5 + $0x70] sm:$0xff]   ;;  %v976_v14 = vld [vmem:[#allocation5 + $0x68] sm:$0xff]   ;;  %s754_s10 = sshll.u32 %s1061_s9, 4  ;;  %s755_s10 = int_to_ptr.vmem [resolvable:$true] %s754_s10 }
  0x35   :  { %514 = vmatprep.mubr.bf16.mxu0 %v159_v59  ;;  %555 = vmatprep.mubr.bf16.mxu1 %v159_v59  ;;  %v973_v11 = vld [vmem:[#allocation5 + $0x38] sm:$0xff]   ;;  %v975_v13 = vld [vmem:[#allocation5 + $0x30] sm:$0xff]   ;;  %v977_v15 = vld [vmem:[#allocation5 + $0x28] sm:$0xff]   ;;  %s1028_s11 = scalar_lea.vmem %s755_s10, 32  ;;  %p1033_p11 = scmp.lt.s32.totalorder %s755_s10, %s755_s10 }
  0x36   :  { %v978_v16 = vld [vmem:[#allocation5 + $0x60] sm:$0xff]   ;;  %v980_v18 = vld [vmem:[#allocation5 + $0x58] sm:$0xff]   ;;  %v982_v20 = vld [vmem:[#allocation5 + $0x50] sm:$0xff]   ;;  %p1029_p10 = scmp.ne.s32.totalorder %s755_s10, %s1028_s11  ;;  %p1034_p12 = scmp.lt.s32.totalorder %s1028_s11, %s1028_s11 }
  0x37   :  { %495 = vmatpush1.bf16.msra.mxu0 %v916_v26  ;;  %536 = vmatpush1.bf16.msra.mxu1 %v917_v27  ;;  %v979_v17 = vld [vmem:[#allocation5 + $0x20] sm:$0xff]   ;;  %v981_v19 = vld [vmem:[#allocation5 + $0x18] sm:$0xff]   ;;  %v983_v21 = vld [vmem:[#allocation5 + $0x10] sm:$0xff]   ;;  %v119_v26 = vsub.s32 0, %v1098_v45  ;;  %v127_v27 = vsub.s32 2, %v1098_v45 }
  0x38   :  { %496 = vmatprep.subr.bf16.mxu0 %v918_v28  ;;  %537 = vmatprep.subr.bf16.mxu1 %v920_v29  ;;  %v984_v22 = vld [vmem:[#allocation5 + $0x48] sm:$0xff]   ;;  %v986_v24 = vld [vmem:[#allocation5 + $0x40] sm:$0xff]   ;;  %v123_v29 = vsub.s32 1, %v1098_v45  ;;  %p1035_p13 = por %p1034_p12, %p1033_p11 }
  0x39   :  { %v985_v23 = vld [vmem:[#allocation5 + $0x8] sm:$0xff]   ;;  %v987_v25 = vld [vmem:[#allocation5] sm:$0xff]  }
  0x3a   :  { %v115_v28 = vld [vmem:[%s1119_s2] sm:$0xf]  ;;  %p1036_p0 = pnand %p1035_p13, %p1029_p10 }
  0x3b   :  { %497 = vmatpush1.bf16.msra.mxu0 %v922_v30  ;;  %538 = vmatpush1.bf16.msra.mxu1 %v923_v31  ;;  %v131_v30 = vsub.s32 3, %v1098_v45  ;;  %v120_v31 = vrot.slane %v115_v28, %v119_v26  ;;  %v829_v56 = vld [vmem:[%s1121_s4] ss:$0 sm:$0xff] }
  0x3c   :  { %498 = vmatprep.subr.bf16.mxu0 %v924_v32  ;;  %539 = vmatprep.subr.bf16.mxu1 %v926_v33  ;;  %v128_v32 = vrot.slane %v115_v28, %v127_v27  ;;  %v124_v33 = vrot.slane %v115_v28, %v123_v29 }
  0x3f   :  { %499 = vmatpush2.bf16.msra.mxu0 %v928_v34  ;;  %540 = vmatpush2.bf16.msra.mxu1 %v929_v35  ;;  %v132_v34 = vrot.slane %v115_v28, %v131_v30 }
  0x40   :  { %500 = vmatprep.subr.bf16.mxu0 %v930_v36  ;;  %541 = vmatprep.subr.bf16.mxu1 %v932_v37 }
  0x43   :  { %501 = vmatpush2.bf16.msra.mxu0 %v934_v41  ;;  %542 = vmatpush2.bf16.msra.mxu1 %v935_v42 }
  0x44   :  { %502 = vmatprep.subr.bf16.mxu0 %v936_v43  ;;  %543 = vmatprep.subr.bf16.mxu1 %v938_v44 }
  0x47   :  { %503 = vmatpush2.bf16.msra.mxu0 %v940_v47  ;;  %544 = vmatpush2.bf16.msra.mxu1 %v941_v48 }
  0x48   :  { %504 = vmatprep.subr.bf16.mxu0 %v942_v49  ;;  %545 = vmatprep.subr.bf16.mxu1 %v944_v50 }
  0x4b   :  { %505 = vmatpush2.bf16.msra.mxu0 %v946_v51  ;;  %546 = vmatpush2.bf16.msra.mxu1 %v947_v52 }
  0x4c   :  { %506 = vmatprep.subr.bf16.mxu0 %v948_v55  ;;  %547 = vmatprep.subr.bf16.mxu1 %v950_v57 }
  0x4f   :  { %507 = vmatpush2.bf16.msra.mxu0 %v952_v58  ;;  %548 = vmatpush2.bf16.msra.mxu1 %v953_v60 }
  0x50   :  { %508 = vmatprep.subr.bf16.mxu0 %v954_v61  ;;  %549 = vmatprep.subr.bf16.mxu1 %v956_v62 }
  0x53   :  { %509 = vmatpush2.bf16.msra.mxu0 %v958_v63  ;;  %550 = vmatpush2.bf16.msra.mxu1 %v959_v0 }
  0x54   :  { %510 = vmatprep.subr.bf16.mxu0 %v960_v1  ;;  %551 = vmatprep.subr.bf16.mxu1 %v962_v2 }
  0x57   :  { %511 = vmatpush2.bf16.msra.mxu0 %v964_v3  ;;  %552 = vmatpush2.bf16.msra.mxu1 %v965_v4 }
  0x58   :  { %512 = vmatprep.subr.bf16.mxu0 %v966_v5  ;;  %553 = vmatprep.subr.bf16.mxu1 %v968_v6 }
  0x5b   :  { %513 = vmatpush2.bf16.msra.mxu0 %v970_v7  ;;  %554 = vmatpush2.bf16.msra.mxu1 %v971_v8 }
  0x5c   :  { %846 = vmatprep.subr.bf16.mxu0 %v972_v9 }
  0x5e   :  { %515 = vmatmul.mubr.bf16.vlgmr.msra.gmra.mxu0 %v152_v10  ;;  %556 = vmatmul.mubr.bf16.vlgmr.msra.gmra.mxu1 %v152_v10 }
  0x5f   :  { %847 = vmatpush3.bf16.msra.mxu0 %v973_v11 }
  0x60   :  { %848 = vmatprep.subr.bf16.mxu0 %v974_v12 }
  0x63   :  { %849 = vmatpush3.bf16.msra.mxu0 %v975_v13 }
  0x64   :  { %850 = vmatprep.subr.bf16.mxu0 %v976_v14 }
  0x67   :  { %851 = vmatpush3.bf16.msra.mxu0 %v977_v15 }
  0x68   :  { %852 = vmatprep.subr.bf16.mxu0 %v978_v16 }
  0x6b   :  { %853 = vmatpush3.bf16.msra.mxu0 %v979_v17 }
  0x6c   :  { %854 = vmatprep.subr.bf16.mxu0 %v980_v18 }
  0x6f   :  { %855 = vmatpush3.bf16.msra.mxu0 %v981_v19 }
  0x70   :  { %856 = vmatprep.subr.bf16.mxu0 %v982_v20 }
  0x73   :  { %857 = vmatpush3.bf16.msra.mxu0 %v983_v21 }
  0x74   :  { %858 = vmatprep.subr.bf16.mxu0 %v984_v22 }
  0x77   :  { %859 = vmatpush3.bf16.msra.mxu0 %v985_v23 }
  0x78   :  { %860 = vmatprep.subr.bf16.mxu0 %v986_v24 }
  0x7b   :  { %861 = vmatpush3.bf16.msra.mxu0 %v987_v25 }
 0x11e   :  { %v516_v35 = vpop.f32.mrf.mxu0  ;;  %v557_v36 = vpop.f32.mrf.mxu1 }
 0x11f   :  { %v517_v37 = vadd.f32 %v516_v35, %v120_v31  ;;  %v558_v38 = vadd.f32 %v557_v36, %v128_v32 }
 0x120   :  { %v518_v39 = vpop.f32.mrf.mxu0  ;;  %v559_v40 = vpop.f32.mrf.mxu1 }
 0x121   :  { %v564_v41 = vmax.f32 %v517_v37, 0.0  ;;  %v566_v42 = vmax.f32 %v558_v38, 0.0  ;;  %v519_v43 = vadd.f32 %v518_v39, %v124_v33  ;;  %v560_v44 = vadd.f32 %v559_v40, %v132_v34 }
 0x122   :  { %v520_v46 = vpop.f32.mrf.mxu0  ;;  %v561_v47 = vpop.f32.mrf.mxu1 }
 0x123   :  { %v565_v48 = vmax.f32 %v519_v43, 0.0  ;;  %v567_v49 = vmax.f32 %v560_v44, 0.0  ;;  %v568_v50 = vmax.f32 %v564_v41, %v566_v42 }
 0x124   :  { %v521_v45 = vpop.f32.mrf.mxu0  ;;  %v562_v51 = vpop.f32.mrf.mxu1 }
 0x125   :  { %v569_v52 = vmax.f32 %v565_v48, %v567_v49  ;;  %v570_v54 = vpack.c.bf16 %v568_v50, %v568_v50 }
 0x127   :  { %v571_v53 = vpack.c.bf16 %v569_v52, %v569_v52 }
 0x129   :  { %739 = vmatprep.mubr.bf16.mxu0 %v571_v53 }
 0x12a   :  { %740 = vmatmul.mubr.bf16.vlgmr.msra.gmra.mxu0 %v570_v54 }
 0x1ea   :  { %v862_v55 = vpop.f32.mrf.mxu0 }
 0x1ec   :  { %v863_v57 = vpop.f32.mrf.mxu0 }
 0x1ed   :  { %v864_v58 = vadd.f32 %v863_v57, %v862_v55 }
 0x1ee   :  { %v865_v59 = vpop.f32.mrf.mxu0 }
 0x1ef   :  { %v742_v60 = vadd.f32 %v864_v58, %v829_v56 }
 0x1f0   :  { %v866_v61 = vpop.f32.mrf.mxu0 }
 0x1f1   :  { %747 = vst [vmem:[#allocation7] sm:$0x3] %v742_v60 }
 0x1f2   :  { %1039 = shalt.err (!%p1036_p0)
}
 0x1f3   :  { %757 = dma.vmem_to_hbm [thread:$0]  %s755_s10, 32, %s1122_s5, [#allocation4]  }
 0x1f4   :  { %1052 = dma.done.wait [#allocation4], 32  }
 0x1f5   :  { %1053 = vsyncadd [#allocation4], 4294967264 }
 0x1f6   :  { %761 = vsyncpa [#allocation3], 1 }
 0x1f7   :  { %762 = vsyncpa [#allocation6], 1 }
 0x1f8   :  { %763 = vsyncpa [#allocation4], 1 }

</bundles_post_ra>
